<compile_context>
chip_gen: v5e
topology: v5e:2x2
jax: 0.10.0
libtpu: 0.0.40
codegen_flags: <defaults>
</compile_context>

<pallas_src>
import jax
import jax.numpy as jnp
from jax.experimental import pallas as pl
from jax.experimental.pallas import tpu as pltpu


def _deepstream_kernel(x_ref, out_ref):
    # x_ref block:   (C, TN)   -- batch dim squeezed, C = 4 + num_classes
    # out_ref block: (8, TN)   -- rows 0..3 boxes, row 4 score, row 5 class idx, 6..7 pad
    x = x_ref[...]                                   # native dtype, (C, TN)
    C, TN = x.shape
    nc = C - 4

    xf = x.astype(jnp.float32)

    # ---- class max / first-argmax over the channel (sublane) axis ----
    # Mask the 4 box rows to -inf instead of slicing at sublane 4 (avoids a
    # tile-boundary-crossing sublane slice; the VPU select is free here).
    ch = jax.lax.broadcasted_iota(jnp.int32, (C, TN), 0)         # (C, TN)
    cls = jnp.where(ch >= 4, xf, -jnp.inf)                       # (C, TN)
    max_val = jnp.max(cls, axis=0, keepdims=True)                # (1, TN)

    # Box rows can only tie at -inf when every class value is -inf; the clip on
    # the (1, TN) result handles that (and NaN columns) without a (C, TN) AND.
    cand = jnp.where(cls == max_val, ch, jnp.int32(C))           # (C, TN)
    arg = jnp.min(cand, axis=0, keepdims=True) - 4               # (1, TN)
    arg = jnp.clip(arg, 0, nc - 1)

    # ---- single unmasked full-block store ----
    packed = jnp.concatenate(
        [
            x[0:4, :].astype(out_ref.dtype),          # boxes (4, TN)
            max_val.astype(out_ref.dtype),            # score (1, TN)
            arg.astype(out_ref.dtype),                # class (1, TN)
            jnp.zeros((2, TN), out_ref.dtype),        # pad to 8 sublanes
        ],
        axis=0,
    )
    out_ref[...] = packed


def _choose_tiling(batch: int, n: int, max_tile_n: int):
    """Pick (tile_n, n_pad): tile_n multiple of 128, tile_n * nb == n_pad >= n,
    with minimal padding waste and at least 2 total grid steps (v7x megacore)."""
    n128 = pl.cdiv(n, 128) * 128
    max_tile = max(128, (max_tile_n // 128) * 128)
    nb = pl.cdiv(n128, max_tile)                # blocks per batch row
    if batch * nb < 2 and n128 >= 256:          # keep both v7x TensorCores busy
        nb = 2
    tile_n = pl.cdiv(pl.cdiv(n128, nb), 128) * 128
    n_pad = nb * tile_n
    return tile_n, n_pad


def deepstream_output(x, *, max_tile_n: int = 8192):
    """x: (B, C, N) with C = 4 + num_classes. Returns (boxes, scores, classes)."""
    B, C, N = x.shape
    assert C > 4, "need at least one class channel"
    nc = C - 4

    tile_n, n_pad = _choose_tiling(B, N, max_tile_n)
    x_in = x if n_pad == N else jnp.pad(x, ((0, 0), (0, 0), (0, n_pad - N)))

    # Keep I/O in the model dtype when class indices are exact in it; otherwise f32.
    in_dtype = jnp.dtype(x.dtype)
    packed_dtype = in_dtype if (in_dtype == jnp.dtype(jnp.float32) or nc <= 256) else jnp.float32

    # Explicit VMEM cap sized from the double-buffered block footprint (+headroom),
    # valid for v5e (16 MiB scoped default), v6e and v7x (64 MiB physical).
    block_bytes = 2 * (C * tile_n * in_dtype.itemsize) \
                + 2 * (8 * tile_n * jnp.dtype(packed_dtype).itemsize)
    vmem_limit = int(min(max(2 * block_bytes + (4 << 20), 16 << 20), 48 << 20))

    grid = (B, n_pad // tile_n)

    packed = pl.pallas_call(
        _deepstream_kernel,
        out_shape=jax.ShapeDtypeStruct((B, 8, n_pad), packed_dtype),
        grid_spec=pltpu.PrefetchScalarGridSpec(
            num_scalar_prefetch=0,
            grid=grid,
            in_specs=[
                pl.BlockSpec((None, C, tile_n), lambda b, n: (b, 0, n)),
            ],
            out_specs=pl.BlockSpec((None, 8, tile_n), lambda b, n: (b, 0, n)),
        ),
        compiler_params=pltpu.CompilerParams(
            dimension_semantics=("parallel", "parallel"),
            vmem_limit_bytes=vmem_limit,
        ),
    )(x_in)

    # One extra pass over the small packed slab (single transpose), then cheap slices.
    packed_t = jnp.transpose(packed[:, :, :N], (0, 2, 1))          # (B, N, 8)
    det_boxes = packed_t[:, :, 0:4].astype(x.dtype)                # (B, N, 4)
    det_scores = packed_t[:, :, 4:5].astype(x.dtype)               # (B, N, 1)
    det_classes = packed_t[:, :, 5:6].astype(jnp.float32)          # (B, N, 1) float
    return det_boxes, det_scores, det_classes


def _reference(x):
    xt = jnp.transpose(x, (0, 2, 1))               # (B, N, C)
    boxes = xt[:, :, :4]
    cls = xt[:, :, 4:]
    scores = jnp.max(cls, axis=2, keepdims=True)
    classes = jnp.argmax(cls, axis=2, keepdims=True).astype(jnp.float32)
    return boxes, scores, classes


if __name__ == "__main__":
    # Small YOLO-like head; N deliberately NOT a multiple of 128 to exercise padding.
    B, NUM_CLASSES, N = 2, 16, 400
    C = 4 + NUM_CLASSES

    key = jax.random.PRNGKey(0)
    x = jax.random.normal(key, (B, C, N), dtype=jnp.float32)

    det_boxes, det_scores, det_classes = deepstream_output(x)
    jax.block_until_ready((det_boxes, det_scores, det_classes))

    ref_boxes, ref_scores, ref_classes = _reference(x)
    assert det_boxes.shape == (B, N, 4)
    assert det_scores.shape == (B, N, 1)
    assert det_classes.shape == (B, N, 1)
    assert jnp.allclose(det_boxes, ref_boxes)
    assert jnp.allclose(det_scores, ref_scores)
    assert jnp.allclose(det_classes, ref_classes)

    print("KERNEL_OK")
</pallas_src>

<mosaic_0001>
module attributes {stable_mosaic.version = 11 : i64} {
  func.func @_deepstream_kernel(%arg0: i32, %arg1: i32, %arg2: memref<1x20x512xf32, #tpu.memory_space<vmem>>, %arg3: memref<1x8x512xf32, #tpu.memory_space<vmem>>) attributes {dimension_semantics = [#tpu.dimension_semantics<parallel>, #tpu.dimension_semantics<parallel>], iteration_bounds = array<i64: 2, 1>, scalar_prefetch = 0 : i64, scratch_operands = 0 : i64, tpu.core_type = #tpu.core_type<tc>, window_params = [{transform_indices = @transform_0, window_bounds = array<i64: 1, 20, 512>}, {transform_indices = @transform_1, window_bounds = array<i64: 1, 8, 512>}]} {
    %c0 = arith.constant 0 : index
    %c0_0 = arith.constant 0 : index
    %c0_1 = arith.constant 0 : index
    %0 = vector.load %arg2[%c0, %c0_0, %c0_1] : memref<1x20x512xf32, #tpu.memory_space<vmem>>, vector<1x20x512xf32>
    %1 = vector.shape_cast %0 : vector<1x20x512xf32> to vector<20x512xf32>
    %2 = tpu.iota {dimensions = array<i32: 0>} : vector<20x512xi32>
    %c4_i32 = arith.constant 4 : i32
    %3 = vector.broadcast %c4_i32 : i32 to vector<20x512xi32>
    %4 = arith.cmpi sge, %2, %3 : vector<20x512xi32>
    %cst = arith.constant 0xFF800000 : f32
    %5 = vector.broadcast %cst : f32 to vector<20x512xf32>
    %6 = arith.select %4, %1, %5 : vector<20x512xi1>, vector<20x512xf32>
    %cst_2 = arith.constant dense<0xFF800000> : vector<512xf32>
    %7 = vector.multi_reduction <maximumf>, %6, %cst_2 [0] : vector<20x512xf32> to vector<512xf32>
    %8 = vector.shape_cast %7 : vector<512xf32> to vector<1x512xf32>
    %9 = vector.broadcast %8 : vector<1x512xf32> to vector<20x512xf32>
    %10 = arith.cmpf oeq, %6, %9 : vector<20x512xf32>
    %c20_i32 = arith.constant 20 : i32
    %11 = vector.broadcast %c20_i32 : i32 to vector<20x512xi32>
    %12 = arith.select %10, %2, %11 : vector<20x512xi1>, vector<20x512xi32>
    %cst_3 = arith.constant dense<2147483647> : vector<512xi32>
    %13 = vector.multi_reduction <minsi>, %12, %cst_3 [0] : vector<20x512xi32> to vector<512xi32>
    %14 = vector.shape_cast %13 : vector<512xi32> to vector<1x512xi32>
    %c4_i32_4 = arith.constant 4 : i32
    %15 = vector.broadcast %c4_i32_4 : i32 to vector<1x512xi32>
    %16 = arith.subi %14, %15 : vector<1x512xi32>
    %c0_i32 = arith.constant 0 : i32
    %c15_i32 = arith.constant 15 : i32
    %17 = vector.broadcast %c0_i32 : i32 to vector<1x512xi32>
    %18 = arith.maxsi %17, %16 : vector<1x512xi32>
    %19 = vector.broadcast %c15_i32 : i32 to vector<1x512xi32>
    %20 = arith.minsi %19, %18 : vector<1x512xi32>
    %21 = vector.extract_strided_slice %1 {offsets = [0, 0], sizes = [4, 512], strides = [1, 1]} : vector<20x512xf32> to vector<4x512xf32>
    %22 = arith.sitofp %20 : vector<1x512xi32> to vector<1x512xf32>
    %cst_5 = arith.constant 0.000000e+00 : f32
    %23 = vector.broadcast %cst_5 : f32 to vector<2x512xf32>
    %24 = tpu.concatenate %21, %8, %22, %23 in 0 : vector<4x512xf32>, vector<1x512xf32>, vector<1x512xf32>, vector<2x512xf32> -> vector<8x512xf32>
    %c0_6 = arith.constant 0 : index
    %c0_7 = arith.constant 0 : index
    %c0_8 = arith.constant 0 : index
    %25 = vector.load %arg3[%c0_6, %c0_7, %c0_8] : memref<1x8x512xf32, #tpu.memory_space<vmem>>, vector<1x8x512xf32>
    %26 = vector.shape_cast %25 : vector<1x8x512xf32> to vector<8x512xf32>
    %27 = vector.shape_cast %24 : vector<8x512xf32> to vector<1x8x512xf32>
    tpu.vector_store %arg3[%c0_6, %c0_7, %c0_8], %27 {strides = array<i32>} : memref<1x8x512xf32, #tpu.memory_space<vmem>>, vector<1x8x512xf32>,
    return
  }
  func.func @transform_0(%arg0: i32, %arg1: i32) -> (i32, i32, i32) {
    %c0_i32 = arith.constant 0 : i32
    %c0_i32_0 = arith.constant 0 : i32
    return %arg0, %c0_i32, %arg1 : i32, i32, i32
  }
  func.func @transform_1(%arg0: i32, %arg1: i32) -> (i32, i32, i32) {
    %c0_i32 = arith.constant 0 : i32
    %c0_i32_0 = arith.constant 0 : i32
    return %arg0, %c0_i32, %arg1 : i32, i32, i32
  }
}

</mosaic_0001>

<bundles_post_ra>
// kernel: tpu_custom_call.1
= control target key start
LH: loop header
LB: loop body
LE: loop exit
PB: predicated region body
PF: predicated region fallthrough
CT: control target
= control target key end

     0   :  { %6 = vsyncpa [#allocation3], 0  ;;  %s796_s0 = inlined_call_operand.vmem [shape: f32[2,20,512], index: 0, kind: input, shape index: {}]   ;;  %s797_s1 = inlined_call_operand.hbm [shape: f32[2,8,512], index: 1, kind: output, shape index: {}]  }
   0x1   :  { %8 = vsyncpa [#allocation3 + $0x1], 0  ;;  %s594_s6 = smov 0   ;;  %s596_s7 = smov 0  }
   0x2   :  { %s598_s8 = smov 0   ;;  %s600_s9 = smov 0  }
   0x3   :  { %s602_s10 = smov 0   ;;  %s604_s11 = smov 0  }
   0x4 LB: > { %s431_s12 = sadd.s32 4294967295, %s582_s11   ;;  %s432_s13 = sadd.s32 4294967294, %s582_s11   ;;  %s582_s11 = sphi %s604_s11, %s14_s11   ;;  %s578_s10 = sphi %s602_s10, %s804_s10   ;;  %s574_s9 = sphi %s600_s9, %s803_s9   ;;  %s570_s8 = sphi %s598_s8, %s802_s8   ;;  %s566_s7 = sphi %s596_s7, %s801_s7   ;;  %s562_s6 = sphi %s594_s6, %s800_s6  }
   0x5   : > { %s26_s14 = sadd.s32 1, %s578_s10  ;;  %s63_s15 = sadd.s32 1, %s570_s8 }
   0x6   : > { %p28_p0 = scmp.ge.s32.totalorder %s26_s14, 2  ;;  %p73_p1 = scmp.ne.s32.totalorder %s570_s8, %s566_s7 }
   0x7   : > { %p74_p2 = scmp.eq.s32.totalorder %s431_s12, 1  ;;  %p79_p3 = scmp.ne.s32.totalorder %s566_s7, %s562_s6 }
   0x8   : > { %s806_s14 = smov (%p28_p0, %s26_s14), 0  ;;  %p80_p5 = scmp.eq.s32.totalorder %s432_s13, 1 }
   0x9   : > { %p634_p4 = por %p74_p2, %p73_p1  ;;  %s58_s17 = ssub.s32 %s578_s10, %s806_s14 }
   0xa   : > { %p435_p6 = scmp.ge.s32.totalorder %s582_s11, 1  ;;  %p61_p7 = scmp.eq.s32.totalorder %s58_s17, 0 }
   0xb   : > { %p641_p8 = por %p80_p5, %p79_p3  ;;  %p111_p9 = scmp.lt.s32.totalorder %s582_s11, 3 }
   0xc   : > { %s647_s19 = scalar_select %p61_p7, %s570_s8, %s63_s15  }
   0xd   : > { %p112_p10 = pnand %p435_p6, %p111_p9 }
   0xe   : > { %p136_p11 = scmp.lt.s32.totalorder (!%p112_p10), %s574_s9, 1  ;;  %s132_s25 = sand.u32 (!%p112_p10), 1, %s566_s7  }
   0xf   : > { %115 = sbr.rel (%p112_p10) target bundleno = 84 (0x54), region = 24  ;;  %s436_s26 = sshll.u32 (!%p112_p10), %s132_s25, 5 }
  0x10   : > { %s134_s27 = scalar_lea.vmem (!%p112_p10), [#allocation2], %s436_s26  ;;  %s447_s28 = sshll.u32 (!%p112_p10), %s574_s9, 5 }
  0x11   : > { %s350_s2 = scalar_lea.hbm (!%p112_p10), %s797_s1, %s447_s28  ;;  %s352_s3 = sshll.u32 (!%p112_p10), %s134_s27, 4  ;;  %s353_s3 = int_to_ptr.vmem [resolvable:$true] %s352_s3 }
  0x12   : > { %s354_s4 = sshll.u32 (!%p112_p10), %s350_s2, 4  ;;  %s337_s5 = scalar_lea.sflag (!%p112_p10), [#allocation3], %s132_s25  ;;  %s355_s4 = int_to_ptr.hbm [resolvable:$true] %s354_s4 }
  0x13   : > { %s524_s17 = scalar_lea.hbm (!%p112_p10), %s797_s1, 64 }
  0x14   : > { %v158_v0 = vlaneseq  ;;  %s137_s20 = scalar_select %p136_p11, %s574_s9, 1  ;;  %vm178_vm1 = vcmask 1043456  }
  0x15   : > { %s518_s9 = sshra.s32 %s355_s4, 4  ;;  %s519_s9 = int_to_ptr.hbm [resolvable:$true] %s518_s9 }
  0x16   : > { %v650_v1 = vshrl.u32 %v158_v0, 7  ;;  %s448_s21 = smul.u32 96, %s137_s20  ;;  %s520_s12 = scalar_lea.hbm %s519_s9, 32 }
  0x17   : > { %p521_p12 = scmp.ne.s32.totalorder %s519_s9, %s520_s12  ;;  %p525_p1 = scmp.lt.s32.totalorder %s519_s9, %s797_s1 }
  0x18   : > { %vm162_vm0 = vcmp.ge.s32.totalorder %v650_v1, 4  ;;  %s143_s24 = scalar_lea.vmem %s796_s0, %s448_s21  ;;  %v160_v46 = vadd.s32 8, %v650_v1  ;;  %v161_v47 = vadd.s32 16, %v650_v1  ;;  %p526_p2 = scmp.lt.s32.totalorder %s524_s17, %s520_s12 }
  0x19   : > { %v657_v2 = vld [vmem:[%s143_s24] sm:$0xff]  ;;  %v663_v7 = vld [vmem:[%s143_s24 + $0x8] sm:$0xff]  ;;  %v669_v13 = vld [vmem:[%s143_s24 + $0x10] sm:$0xff]  ;;  %p522_p13 = pnand %p521_p12, %p634_p4 }
  0x1a   : > { %v150_v3 = vld [vmem:[%s143_s24 + $0x20] sm:$0xff]  ;;  %v165_v5 = vsel %vm162_vm0, %v657_v2, -inf  ;;  %v151_v8 = vld [vmem:[%s143_s24 + $0x28] sm:$0xff]  ;;  %v166_v11 = vsel %vm162_vm0, %v663_v7, -inf  ;;  %v671_v14 = vld [vmem:[%s143_s24 + $0x30] sm:$0xff]  ;;  %v678_v17 = vsel %vm162_vm0, %v669_v13, -inf  ;;  %p527_p3 = por %p526_p2, %p525_p1 }
  0x1b   : > { %v154_v4 = vld [vmem:[%s143_s24 + $0x40] sm:$0xf]  ;;  %v155_v9 = vld [vmem:[%s143_s24 + $0x48] sm:$0xf]  ;;  %v177_v10 = vmax.f32 %v165_v5, %v150_v3  ;;  %v673_v15 = vld [vmem:[%s143_s24 + $0x50] sm:$0xf]  ;;  %v187_v16 = vmax.f32 %v166_v11, %v151_v8  ;;  %v196_v23 = vmax.f32 %v678_v17, %v671_v14  ;;  %p523_p0 = pneg %p522_p13 }
  0x1c   : > { %v179_v6 = vsel %vm178_vm1, %v154_v4, -inf  ;;  %v188_v12 = vsel %vm178_vm1, %v155_v9, -inf  ;;  %v197_v18 = vsel %vm178_vm1, %v673_v15, -inf  ;;  %v682_v19 = vld [vmem:[%s143_s24 + $0x18] sm:$0xff] }
  0x1d   : > { %v684_v20 = vld [vmem:[%s143_s24 + $0x38] sm:$0xff]  ;;  %v180_v22 = vmax.f32 %v177_v10, %v179_v6  ;;  %v693_v24 = vsel %vm162_vm0, %v682_v19, -inf  ;;  %v189_v26 = vmax.f32 %v187_v16, %v188_v12  ;;  %v198_v29 = vmax.f32 %v196_v23, %v197_v18  ;;  %p528_p5 = pnand %p527_p3, %p523_p0 }
  0x1e   : > { %v686_v21 = vld [vmem:[%s143_s24 + $0x58] sm:$0xf]  ;;  %v205_v27 = vmax.f32 %v693_v24, %v684_v20 }
  0x1f   : > { %v206_v25 = vsel %vm178_vm1, %v686_v21, -inf  ;;  %v181_v28 = vrot.slane %v180_v22, 4  ;;  %v190_v30 = vrot.slane %v189_v26, 4  ;;  %v199_v33 = vrot.slane %v198_v29, 4 }
  0x20   : > { %v207_v31 = vmax.f32 %v205_v27, %v206_v25 }
  0x21   : > { %v182_v32 = vmax.f32 %v180_v22, %v181_v28  ;;  %v191_v34 = vmax.f32 %v189_v26, %v190_v30  ;;  %v200_v37 = vmax.f32 %v198_v29, %v199_v33 }
  0x22   : > { %v208_v35 = vrot.slane %v207_v31, 4 }
  0x23   : > { %v183_v36 = vrot.slane %v182_v32, 2  ;;  %v192_v38 = vrot.slane %v191_v34, 2  ;;  %v201_v41 = vrot.slane %v200_v37, 2 }
  0x24   : > { %v209_v39 = vmax.f32 %v207_v31, %v208_v35 }
  0x25   : > { %v184_v40 = vmax.f32 %v182_v32, %v183_v36  ;;  %v193_v42 = vmax.f32 %v191_v34, %v192_v38  ;;  %v202_v45 = vmax.f32 %v200_v37, %v201_v41 }
  0x26   : > { %v210_v43 = vrot.slane %v209_v39, 2 }
  0x27   : > { %v185_v44 = vrot.slane %v184_v40, 1  ;;  %v194_v48 = vrot.slane %v193_v42, 1  ;;  %v203_v52 = vrot.slane %v202_v45, 1 }
  0x28   : > { %v211_v49 = vmax.f32 %v209_v39, %v210_v43 }
  0x29   : > { %v701_v50 = vmax.f32 %v184_v40, %v185_v44  ;;  %v703_v51 = vmax.f32 %v193_v42, %v194_v48 }
  0x2a   : > { %v212_v53 = vrot.slane %v211_v49, 1 }
  0x2b   : > { %vm214_vm2 = vcmp.eq.f32.partialorder %v165_v5, %v701_v50  ;;  %vm218_vm3 = vcmp.eq.f32.partialorder %v150_v3, %v701_v50  ;;  %vm222_vm4 = vcmp.eq.f32.partialorder %v154_v4, %v701_v50  ;;  %vm215_vm5 = vcmp.eq.f32.partialorder %v166_v11, %v703_v51 }
  0x2c   : > { %v226_v54 = vsel %vm214_vm2, %v650_v1, 20  ;;  %v230_v55 = vsel %vm218_vm3, %v160_v46, 20  ;;  %v234_v56 = vsel %vm222_vm4, %v161_v47, 20  ;;  %vm219_vm7 = vcmp.eq.f32.partialorder %v151_v8, %v703_v51 }
  0x2d   : > { %vm238_vm6 = vcmp.lt.s32.totalorder %v226_v54, %v230_v55  ;;  %v240_v57 = vsel %vm178_vm1, %v234_v56, 2147483647  ;;  %vm223_vm8 = vcmp.eq.f32.partialorder %v155_v9, %v703_v51  ;;  %v227_v59 = vsel %vm215_vm5, %v650_v1, 20 }
  0x2e   : > { %v239_v58 = vsel %vm238_vm6, %v226_v54, %v230_v55  ;;  %v231_v60 = vsel %vm219_vm7, %v160_v46, 20  ;;  %v235_v61 = vsel %vm223_vm8, %v161_v47, 20  ;;  %v715_v3 = vmax.f32 %v202_v45, %v203_v52 }
  0x2f   : > { %vm241_vm9 = vcmp.lt.s32.totalorder %v239_v58, %v240_v57  ;;  %vm252_vm10 = vcmp.lt.s32.totalorder %v227_v59, %v231_v60  ;;  %v254_v62 = vsel %vm178_vm1, %v235_v61, 2147483647  ;;  %v717_v5 = vmax.f32 %v211_v49, %v212_v53 }
  0x30   : > { %v242_v63 = vsel %vm241_vm9, %v239_v58, %v240_v57  ;;  %v253_v0 = vsel %vm252_vm10, %v227_v59, %v231_v60  ;;  %vm216_vm12 = vcmp.eq.f32.partialorder %v678_v17, %v715_v3  ;;  %vm220_vm13 = vcmp.eq.f32.partialorder %v671_v14, %v715_v3 }
  0x31   : > { %v243_v4 = vrot.slane %v242_v63, 4  ;;  %vm255_vm11 = vcmp.lt.s32.totalorder %v253_v0, %v254_v62  ;;  %vm224_vm14 = vcmp.eq.f32.partialorder %v673_v15, %v715_v3  ;;  %v228_v9 = vsel %vm216_vm12, %v650_v1, 20 }
  0x32   : > { %v256_v6 = vsel %vm255_vm11, %v253_v0, %v254_v62  ;;  %v232_v10 = vsel %vm220_vm13, %v160_v46, 20  ;;  %v236_v12 = vsel %vm224_vm14, %v161_v47, 20  ;;  %vm217_vm4 = vcmp.eq.f32.partialorder %v693_v24, %v717_v5 }
  0x33   : > { %vm244_vm15 = vcmp.lt.s32.totalorder %v242_v63, %v243_v4  ;;  %v257_v8 = vrot.slane %v256_v6, 4  ;;  %vm266_vm0 = vcmp.lt.s32.totalorder %v228_v9, %v232_v10  ;;  %v268_v22 = vsel %vm178_vm1, %v236_v12, 2147483647 }
  0x34   : > { %v245_v11 = vsel %vm244_vm15, %v242_v63, %v243_v4  ;;  %v267_v18 = vsel %vm266_vm0, %v228_v9, %v232_v10  ;;  %vm221_vm5 = vcmp.eq.f32.partialorder %v684_v20, %v717_v5  ;;  %vm225_vm7 = vcmp.eq.f32.partialorder %v686_v21, %v717_v5 }
  0x35   : > { %v246_v16 = vrot.slane %v245_v11, 2  ;;  %vm258_vm2 = vcmp.lt.s32.totalorder %v256_v6, %v257_v8  ;;  %vm269_vm3 = vcmp.lt.s32.totalorder %v267_v18, %v268_v22  ;;  %v229_v26 = vsel %vm217_vm4, %v650_v1, 20 }
  0x36   : > { %v259_v17 = vsel %vm258_vm2, %v256_v6, %v257_v8  ;;  %v270_v15 = vsel %vm269_vm3, %v267_v18, %v268_v22  ;;  %v233_v27 = vsel %vm221_vm5, %v160_v46, 20  ;;  %v237_v29 = vsel %vm225_vm7, %v161_v47, 20 }
  0x37   : > { %vm247_vm6 = vcmp.lt.s32.totalorder %v245_v11, %v246_v16  ;;  %v260_v14 = vrot.slane %v259_v17, 2  ;;  %v271_v25 = vrot.slane %v270_v15, 4  ;;  %vm280_vm9 = vcmp.lt.s32.totalorder %v229_v26, %v233_v27 }
  0x38   : > { %v248_v23 = vsel %vm247_vm6, %v245_v11, %v246_v16  ;;  %v281_v30 = vsel %vm280_vm9, %v229_v26, %v233_v27  ;;  %v282_v20 = vsel %vm178_vm1, %v237_v29, 2147483647  ;;  %vm322_vm2 = vcmask 1044480  }
  0x39   : > { %v249_v28 = vrot.slane %v248_v23, 1  ;;  %vm261_vm8 = vcmp.lt.s32.totalorder %v259_v17, %v260_v14  ;;  %vm272_vm10 = vcmp.lt.s32.totalorder %v270_v15, %v271_v25  ;;  %vm283_vm12 = vcmp.lt.s32.totalorder %v281_v30, %v282_v20 }
  0x3a   : > { %v262_v24 = vsel %vm261_vm8, %v259_v17, %v260_v14  ;;  %v273_v32 = vsel %vm272_vm10, %v270_v15, %v271_v25  ;;  %v284_v34 = vsel %vm283_vm12, %v281_v30, %v282_v20  ;;  %vm327_vm4 = vcmask 1045504  }
  0x3b   : > { %vm250_vm11 = vcmp.lt.s32.totalorder %v248_v23, %v249_v28  ;;  %v263_v31 = vrot.slane %v262_v24, 1  ;;  %v274_v33 = vrot.slane %v273_v32, 2  ;;  %v285_v35 = vrot.slane %v284_v34, 4 }
  0x3c   : > { %v251_v21 = vsel %vm250_vm11, %v248_v23, %v249_v28  ;;  %v318_v44 = vsel %vm178_vm1, %v657_v2, %v701_v50  ;;  %v319_v49 = vsel %vm178_vm1, %v663_v7, %v703_v51  ;;  %v320_v59 = vsel %vm178_vm1, %v669_v13, %v715_v3 }
  0x3d   : > { %v438_v1 = vadd.s32 4294967292, %v251_v21  ;;  %vm264_vm13 = vcmp.lt.s32.totalorder %v262_v24, %v263_v31  ;;  %vm275_vm14 = vcmp.lt.s32.totalorder %v273_v32, %v274_v33  ;;  %vm286_vm0 = vcmp.lt.s32.totalorder %v284_v34, %v285_v35 }
  0x3e   : > { %v265_v36 = vsel %vm264_vm13, %v262_v24, %v263_v31  ;;  %v276_v38 = vsel %vm275_vm14, %v273_v32, %v274_v33  ;;  %v287_v41 = vsel %vm286_vm0, %v284_v34, %v285_v35  ;;  %v321_v13 = vsel %vm178_vm1, %v682_v19, %v717_v5 }
  0x3f   : > { %vm298_vm15 = vcmp.gt.s32.totalorder %v438_v1, 0  ;;  %v439_v37 = vadd.s32 4294967292, %v265_v36  ;;  %v277_v40 = vrot.slane %v276_v38, 1  ;;  %v288_v42 = vrot.slane %v287_v41, 2 }
  0x40   : > { %v299_v39 = vsel %vm298_vm15, %v438_v1, 0 }
  0x41   : > { %vm306_vm3 = vcmp.lt.s32.totalorder %v299_v39, 15  ;;  %vm300_vm5 = vcmp.gt.s32.totalorder %v439_v37, 0  ;;  %vm278_vm6 = vcmp.lt.s32.totalorder %v276_v38, %v277_v40  ;;  %vm289_vm8 = vcmp.lt.s32.totalorder %v287_v41, %v288_v42 }
  0x42   : > { %v307_v43 = vsel %vm306_vm3, %v299_v39, 15  ;;  %v301_v45 = vsel %vm300_vm5, %v439_v37, 0  ;;  %v279_v47 = vsel %vm278_vm6, %v276_v38, %v277_v40  ;;  %v290_v53 = vsel %vm289_vm8, %v287_v41, %v288_v42 }
  0x43   : > { %v314_v46 = vcvt.s32.f32 %v307_v43  ;;  %vm308_vm7 = vcmp.lt.s32.totalorder %v301_v45, 15  ;;  %v440_v52 = vadd.s32 4294967292, %v279_v47  ;;  %v291_v56 = vrot.slane %v290_v53, 1 }
  0x44   : > { %v309_v48 = vsel %vm308_vm7, %v301_v45, 15 }
  0x45   : > { %v323_v54 = vsel %vm322_vm2, %v318_v44, %v314_v46  ;;  %v315_v55 = vcvt.s32.f32 %v309_v48  ;;  %vm302_vm9 = vcmp.gt.s32.totalorder %v440_v52, 0  ;;  %vm292_vm10 = vcmp.lt.s32.totalorder %v290_v53, %v291_v56 }
  0x46   : > { %v328_v2 = vsel %vm327_vm4, %v323_v54, 0.0  ;;  %v303_v57 = vsel %vm302_vm9, %v440_v52, 0  ;;  %v293_v7 = vsel %vm292_vm10, %v290_v53, %v291_v56 }
  0x47   : > { %332 = vst [vmem:[%s134_s27] sm:$0xff] %v328_v2  ;;  %v324_v50 = vsel %vm322_vm2, %v319_v49, %v315_v55  ;;  %vm310_vm11 = vcmp.lt.s32.totalorder %v303_v57, 15  ;;  %v441_v60 = vadd.s32 4294967292, %v293_v7 }
  0x48   : > { %v329_v58 = vsel %vm327_vm4, %v324_v50, 0.0  ;;  %v311_v51 = vsel %vm310_vm11, %v303_v57, 15 }
  0x49   : > { %333 = vst [vmem:[%s134_s27 + $0x8] sm:$0xff] %v329_v58  ;;  %v316_v61 = vcvt.s32.f32 %v311_v51  ;;  %vm304_vm12 = vcmp.gt.s32.totalorder %v441_v60, 0 }
  0x4a   : > { %v305_v63 = vsel %vm304_vm12, %v441_v60, 0 }
  0x4b   : > { %v325_v62 = vsel %vm322_vm2, %v320_v59, %v316_v61  ;;  %vm312_vm13 = vcmp.lt.s32.totalorder %v305_v63, 15 }
  0x4c   : > { %v330_v0 = vsel %vm327_vm4, %v325_v62, 0.0  ;;  %v313_v4 = vsel %vm312_vm13, %v305_v63, 15 }
  0x4d   : > { %334 = vst [vmem:[%s134_s27 + $0x10] sm:$0xff] %v330_v0  ;;  %v317_v3 = vcvt.s32.f32 %v313_v4 }
  0x4f   : > { %v326_v6 = vsel %vm322_vm2, %v321_v13, %v317_v3 }
  0x50   : > { %v331_v8 = vsel %vm327_vm4, %v326_v6, 0.0 }
  0x51   : > { %335 = vst [vmem:[%s134_s27 + $0x18] sm:$0xff] %v331_v8 }
  0x52   : > { %531 = shalt.err (!%p528_p5)
}
  0x53   : > { %449 = dma.vmem_to_hbm [thread:$0]  (%p634_p4), %s353_s3, 512, %s355_s4, %s337_s5  }
  0x54 PF: > { %p455_p6 = scmp.ge.s32.totalorder %s582_s11, 2  ;;  %s366_s22 = sand.u32 1, %s562_s6  }
  0x55   : > { %s367_s23 = scalar_lea.sflag [#allocation3], %s366_s22 }
  0x56   : > { %p452_p7 = pnand %p455_p6, %p641_p8 }
  0x58   : > { %p453_p9 = pneg %p452_p7 }
  0x5a   : > { %557 = dma.done.wait (%p453_p9), %s367_s23, 512  }
  0x5b   : > { %559 = vsyncadd (%p453_p9), %s367_s23, 4294966784  ;;  %s14_s11 = sadd.s32 1, %s582_s11   ;;  %s800_s6 = smov %s566_s7 }
  0x5c   : > { %p11_p10 = scmp.ge.s32.totalorder %s14_s11, 4   ;;  %s801_s7 = smov %s570_s8 }
  0x5d   : > { %s802_s8 = smov %s647_s19  ;;  %s803_s9 = smov %s578_s10 }
  0x5e   : > { %s804_s10 = smov %s806_s14  ;;  %13 = sbr.rel (!%p11_p10) target bundleno = 4 (0x4), region = 59 }
  0x63   :  { %373 = vsyncpa [#allocation3], 1 }
  0x64   :  { %375 = vsyncpa [#allocation3 + $0x1], 1 }

</bundles_post_ra>
